<compile_context>
chip_gen: v6e
topology: v6e:2x2x1
jax: 0.10.0
libtpu: 0.0.40
codegen_flags: <defaults>
</compile_context>

<pallas_src>
import jax
import jax.numpy as jnp
from jax.experimental import pallas as pl
from jax.experimental.pallas import tpu as pltpu


def _round_up(x, m):
    return ((x + m - 1) // m) * m


def _num_tensorcores():
    """Best-effort TensorCore-per-device count (2 on v7x, 1 on v5e/v6e).

    Falls back to 1 on any failure so single-core chips never get a forced split.
    """
    try:
        info = pltpu.get_tpu_info()
        for name in ("num_cores", "num_tensorcores", "tensorcore_count",
                     "cores_per_chip", "num_cores_per_chip"):
            v = getattr(info, name, None)
            if v:
                return max(1, min(4, int(v)))
    except Exception:
        pass
    try:
        v = getattr(jax.devices()[0], "num_cores", None)
        if v:
            return max(1, min(4, int(v)))
    except Exception:
        pass
    return 1


def _pick_block_m(M, H, itemsize, num_cores):
    """Bytes-based row tile: ~8 MiB of input per buffer (double-buffered -> ~16 MiB),
    rounded to the sublane multiple, never exceeding the (padded) problem size.
    On multi-TensorCore chips, round the grid up to a multiple of the core count so
    the 1-D parallel grid splits evenly."""
    per_buffer_budget = 8 * 1024 * 1024
    bm = per_buffer_budget // max(1, H * itemsize)
    bm = max(8, (bm // 8) * 8)
    m_pad = _round_up(M, 8)
    bm = min(bm, m_pad)
    if num_cores > 1 and m_pad > 8:
        grid_m = pl.cdiv(M, bm)
        if grid_m % num_cores != 0:
            grid_m = _round_up(max(grid_m, num_cores), num_cores)
            bm = max(8, _round_up(pl.cdiv(M, grid_m), 8))
    return bm


def _value_head_kernel(x_ref, w_ref, b_ref, o_ref):
    # x_ref: (block_m, H) activation tile (native input dtype, VMEM)
    # w_ref: (H, 1)       summary weight  (input dtype, VMEM, fetched once)
    # b_ref: (1, 1)       summary bias    (SMEM scalar, f32)
    # o_ref: (block_m, 1) output tile     (weight dtype)
    #
    # Linear(H, 1): feed the idle MXU with the native dtype; accumulate in f32.
    # (The kernel is HBM-bound, so the N=1 matmul "waste" is free, and this avoids
    #  materializing a block_m x H f32 copy of a bf16 tile in VMEM.)
    y = jnp.dot(x_ref[...], w_ref[...], preferred_element_type=jnp.float32)
    o_ref[...] = (y + b_ref[0, 0]).astype(o_ref.dtype)


def value_head_forward(hidden_states, weight, bias, *, block_m=None):
    """hidden_states: (B, S, H); weight: (1, H); bias: (1,). Returns (B, S, 1)."""
    B, S, H = hidden_states.shape
    M = B * S

    # Glue only: flatten rows. Dropout is identity (eval).
    x = hidden_states.reshape(M, H)
    # One-time weight transpose + cast to the activation dtype in the wrapper (tiny),
    # so the kernel's MXU dot consumes the native input dtype directly.
    w = weight.reshape(H, 1).astype(x.dtype)
    b = bias.reshape(1, 1).astype(jnp.float32)

    in_itemsize = jnp.dtype(x.dtype).itemsize
    out_dtype = weight.dtype
    if block_m is None:
        block_m = _pick_block_m(M, H, in_itemsize, _num_tensorcores())
    grid_m = pl.cdiv(M, block_m)

    cost = pl.CostEstimate(
        flops=2 * M * H,
        transcendentals=0,
        bytes_accessed=(M * H * in_itemsize
                        + H * in_itemsize
                        + M * jnp.dtype(out_dtype).itemsize),
    )

    out = pl.pallas_call(
        _value_head_kernel,
        out_shape=jax.ShapeDtypeStruct((M, 1), out_dtype),
        grid_spec=pltpu.PrefetchScalarGridSpec(
            num_scalar_prefetch=0,
            grid=(grid_m,),
            in_specs=[
                pl.BlockSpec((block_m, H), lambda i: (i, 0)),              # row tile
                pl.BlockSpec((H, 1), lambda i: (0, 0)),                    # weight, fetched once
                pl.BlockSpec(memory_space=pltpu.MemorySpace.SMEM),         # bias scalar
            ],
            out_specs=pl.BlockSpec((block_m, 1), lambda i: (i, 0)),
        ),
        compiler_params=pltpu.CompilerParams(
            dimension_semantics=("parallel",),
            # ~16 MiB of double-buffered input + tiny weight/output buffers fits this
            # comfortably; 32 MiB is safe on v5e/v6e (128 MiB phys) and v7x (64 MiB phys).
            vmem_limit_bytes=32 * 1024 * 1024,
        ),
        cost_estimate=cost,
    )(x, w, b)

    return out.reshape(B, S, 1)


if __name__ == "__main__":
    key = jax.random.PRNGKey(0)
    k_x, k_w = jax.random.split(key)

    # Small shapes consistent with the module: (batch, seq, hidden_size)
    B, S, H = 2, 8, 32
    hidden_states = jax.random.normal(k_x, (B, S, H), dtype=jnp.float32)

    # Deterministic parameter init matching __init__:
    #   summary.weight ~ Normal(mean=5e-7, std=1e-6), shape (1, H)
    #   summary.bias   = 1e-6, shape (1,)
    weight = 5e-7 + 1e-6 * jax.random.normal(k_w, (1, H), dtype=jnp.float32)
    bias = jnp.full((1,), 1e-6, dtype=jnp.float32)

    out = value_head_forward(hidden_states, weight, bias)
    jax.block_until_ready(out)

    # Sanity check against pure-JAX reference.
    ref = hidden_states.reshape(-1, H) @ weight.T + bias
    ref = ref.reshape(B, S, 1)
    assert out.shape == (B, S, 1)
    assert jnp.allclose(out, ref, atol=1e-5, rtol=1e-5)

    print("KERNEL_OK")
</pallas_src>

<mosaic_0001>
module attributes {stable_mosaic.version = 11 : i64} {
  func.func @_value_head_kernel(%arg0: i32, %arg1: memref<16x32xf32, #tpu.memory_space<vmem>>, %arg2: memref<32x1xf32, #tpu.memory_space<vmem>>, %arg3: memref<1x1xf32, #tpu.memory_space<smem>>, %arg4: memref<16x1xf32, #tpu.memory_space<vmem>>) attributes {dimension_semantics = [#tpu.dimension_semantics<parallel>], iteration_bounds = array<i64: 1>, scalar_prefetch = 0 : i64, scratch_operands = 0 : i64, tpu.core_type = #tpu.core_type<tc>, window_params = [{transform_indices = @transform_0, window_bounds = array<i64: 16, 32>}, {pipeline_mode = #tpu.pipeline_mode<synchronous>, transform_indices = @transform_1, window_bounds = array<i64: 32, 1>}, {transform_indices = @transform_2, window_bounds = array<i64: 1, 1>}, {transform_indices = @transform_3, window_bounds = array<i64: 16, 1>}]} {
    %c0 = arith.constant 0 : index
    %c0_0 = arith.constant 0 : index
    %0 = vector.load %arg1[%c0, %c0_0] : memref<16x32xf32, #tpu.memory_space<vmem>>, vector<16x32xf32>
    %c0_1 = arith.constant 0 : index
    %c0_2 = arith.constant 0 : index
    %1 = vector.load %arg2[%c0_1, %c0_2] : memref<32x1xf32, #tpu.memory_space<vmem>>, vector<32x1xf32>
    %cst = arith.constant dense<0.000000e+00> : vector<16x1xf32>
    %2 = tpu.matmul %0, %1, %cst {dimension_numbers = #tpu.dot_dimension_numbers<[1], [0], [0], [1], [0, 0, 1, 1], [], []>} : vector<16x32xf32>, vector<32x1xf32>, vector<16x1xf32> -> vector<16x1xf32>
    %c0_3 = arith.constant 0 : index
    %c0_4 = arith.constant 0 : index
    %3 = memref.load %arg3[%c0_3, %c0_4] : memref<1x1xf32, #tpu.memory_space<smem>>
    %4 = vector.broadcast %3 : f32 to vector<16x1xf32>
    %5 = arith.addf %2, %4 : vector<16x1xf32>
    %c0_5 = arith.constant 0 : index
    %c0_6 = arith.constant 0 : index
    %6 = vector.load %arg4[%c0_5, %c0_6] : memref<16x1xf32, #tpu.memory_space<vmem>>, vector<16x1xf32>
    tpu.vector_store %arg4[%c0_5, %c0_6], %5 {strides = array<i32>} : memref<16x1xf32, #tpu.memory_space<vmem>>, vector<16x1xf32>,
    return
  }
  func.func @transform_0(%arg0: i32) -> (i32, i32) {
    %c0_i32 = arith.constant 0 : i32
    %c0_i32_0 = arith.constant 0 : i32
    return %arg0, %c0_i32 : i32, i32
  }
  func.func @transform_1(%arg0: i32) -> (i32, i32) {
    %c0_i32 = arith.constant 0 : i32
    %c0_i32_0 = arith.constant 0 : i32
    %c0_i32_1 = arith.constant 0 : i32
    return %c0_i32, %c0_i32_0 : i32, i32
  }
  func.func @transform_2(%arg0: i32) -> (i32, i32) {
    %c0_i32 = arith.constant 0 : i32
    %c0_i32_0 = arith.constant 0 : i32
    %c0_i32_1 = arith.constant 0 : i32
    return %c0_i32, %c0_i32_0 : i32, i32
  }
  func.func @transform_3(%arg0: i32) -> (i32, i32) {
    %c0_i32 = arith.constant 0 : i32
    %c0_i32_0 = arith.constant 0 : i32
    return %arg0, %c0_i32 : i32, i32
  }
}

</mosaic_0001>

<bundles_post_ra>
// kernel: tpu_custom_call.1
= control target key start
LH: loop header
LB: loop body
LE: loop exit
PB: predicated region body
PF: predicated region fallthrough
CT: control target
= control target key end

     0   :  { %vm23_vm0 = vcmask 261120   ;;  %vm105_vm1 = vcmask 7168   ;;  %s180_s1 = inlined_call_operand.vmem [shape: f32[32,1], index: 1, kind: input, shape index: {}]   ;;  %s181_s0 = inlined_call_operand.vmem [shape: f32[16,32], index: 0, kind: input, shape index: {}]   ;;  %s182_s2 = inlined_call_operand.<no memory space> [shape: f32[1,1], index: 2, kind: input, shape index: {}]   ;;  %s183_s3 = inlined_call_operand.vmem [shape: f32[16,1], index: 3, kind: output, shape index: {}]  }
   0x1   :  { %v20_v0 = vld [vmem:[%s180_s1 + $0x18] sm:$0xff]  ;;  %v19_v1 = vld [vmem:[%s180_s1 + $0x10] sm:$0xff]  ;;  %v15_v2 = vld [vmem:[%s181_s0] sm:$0xff]  ;;  %v22_v6 = vstv %s182_s2 }
   0x2   :  { %120 = vmatprep.subr.mxu0 %v20_v0  ;;  %v18_v3 = vld [vmem:[%s180_s1 + $0x8] sm:$0xff]  ;;  %128 = vmatprep.mubr.msk.f32.mxu0 %vm23_vm0, %v15_v2  ;;  %v17_v4 = vld [vmem:[%s180_s1] sm:$0xff] }
   0x3   :  { %121 = vmatpush3.msra.mxu0 %v20_v0  ;;  %v16_v5 = vld [vmem:[%s181_s0 + $0x8] sm:$0xff] }
   0x4   :  { %122 = vmatprep.subr.mxu0 %v19_v1 }
   0x5   :  { %123 = vmatpush3.msra.mxu0 %v19_v1 }
   0x6   :  { %124 = vmatprep.subr.mxu0 %v18_v3 }
   0x7   :  { %125 = vmatpush3.msra.mxu0 %v18_v3 }
   0x8   :  { %126 = vmatprep.subr.mxu0 %v17_v4 }
   0x9   :  { %127 = vmatpush3.msra.mxu0 %v17_v4 }
   0xa   :  { %129 = vmatmul.mubr.msk.f32.vlgmr.msra.gmra.mxu0 %vm23_vm0, %v16_v5 }
  0xca   :  { %v130_v7 = vpop.f32.mrf.mxu0 }
  0xcb   :  { %v102_v8 = vadd.f32 %v130_v7, %v22_v6 }
  0xcc   :  { %v96_v9 = vpop.f32.mrf.mxu0 }
  0xcd   :  { %107 = vst.msk [vmem:[%s183_s3 + $0x8] sm:$0xff] %vm105_vm1, %v102_v8  ;;  %v97_v10 = vadd.f32 %v96_v9, %v22_v6 }
  0xcf   :  { %106 = vst.msk [vmem:[%s183_s3] sm:$0xff] %vm105_vm1, %v97_v10 }

</bundles_post_ra>
